<compile_context>
chip_gen: v5e
topology: v5e:2x2
jax: 0.10.0
libtpu: 0.0.40
codegen_flags: <defaults>
</compile_context>

<pallas_src>
import functools

import jax
import jax.numpy as jnp
from jax.experimental import pallas as pl
from jax.experimental.pallas import tpu as pltpu


# ----------------------------------------------------------------------------
# Kernel: one (batch, channel-tile) grid step.
# ----------------------------------------------------------------------------
def _reorg_kernel(x_ref, o_ref, xt_ref, ph_ref, *, stride, width, out_h, out_w):
    """Space-to-depth for one channel tile.

    x_ref : (c_blk, H*W)          lanes = flattened input pixels (dense)
    o_ref : (s, s, c_blk, _h*_w)  lanes = flattened output pixels (dense)
    xt_ref: (H*W, c_blk)          transposed tile: pixels on sublanes
    ph_ref: (_h*_w, c_blk)        one gathered phase, pixels on sublanes
    """
    s = stride
    # Single lane->sublane transpose: the interleaved pixel axis moves to
    # sublanes, where strided extraction is a cheap strided load.
    xt_ref[...] = x_ref[...].T
    for sh in range(s):                       # static unroll over phases
        for sw in range(s):
            # Gather phase (sh, sw): for each output row h, input pixels are
            # at sublane rows (h*s+sh)*W + sw + k*s, k = 0.._w-1.
            for h in range(out_h):
                ph_ref[pl.ds(h * out_w, out_w), :] = xt_ref[
                    pl.ds((h * s + sh) * width + sw, out_w, s), :]
            # One dense transpose-back + one lane-dense store per phase.
            o_ref[sh, sw, :, :] = ph_ref[...].T


# ----------------------------------------------------------------------------
# Tiling heuristics.
# ----------------------------------------------------------------------------
def _ceil_to(x, m):
    return (x + m - 1) // m * m


def _target_tile_bytes():
    """Per-generation target size for the (c_blk, H*W) input tile."""
    try:
        vmem = int(pltpu.get_tpu_info().vmem_capacity_bytes)
    except Exception:  # not on TPU at trace time / API drift
        vmem = 128 << 20
    # ~6 tile-sized buffers are live at once (input x2, output x2, 2 scratch).
    # Mem-bound kernels hit ~85%+ of HBM roofline by 1-2 MiB tiles, so cap at
    # 4 MiB and scale down on small-VMEM parts (v7x: 64 MiB per TensorCore).
    return int(max(1 << 20, min(4 << 20, vmem // 32)))


def _pick_c_block(B, C, HW, itemsize):
    """Channel-tile size: a multiple of 8 that divides C, or C itself."""
    if C % 8 != 0:
        # Tiny / awkward channel counts: single full-C block.
        # TODO(synk): ragged channel tiling (pl.cdiv grid) for huge C that is
        #             not a multiple of 8, and H*W tiling for giant images.
        return C
    row_bytes = HW * itemsize
    target = _target_tile_bytes()
    max_c = max(8, (target // row_bytes) // 8 * 8)
    best = 8
    for d in range(8, C + 1, 8):
        if C % d == 0 and d <= max_c:
            best = d
    # Keep the transposed scratch lane-dense (its lanes = c_blk) when C allows.
    if best < 128 and C % 128 == 0 and 128 * row_bytes <= 2 * target:
        best = 128
    # Give the parallel grid a few steps (pipelining + both v7x TensorCores),
    # as long as tiles stay large enough that per-step overhead is negligible.
    while (B * (C // best) < 4 and best % 16 == 0
           and best * row_bytes > (512 << 10)):
        best //= 2
    return best


# ----------------------------------------------------------------------------
# Wrapper.
# ----------------------------------------------------------------------------
def _reorg_pallas(x, stride):
    B, C, H, W = x.shape
    s = stride
    _h, _w = H // s, W // s
    HW, HWo = H * W, _h * _w
    dbytes = x.dtype.itemsize

    c_blk = _pick_c_block(B, C, HW, dbytes)
    n_c = C // c_blk

    # Padded-to-(8,128) VMEM footprint -> explicit scoped-VMEM limit.
    in_tile = _ceil_to(c_blk, 8) * _ceil_to(HW, 128) * dbytes
    out_tile = s * s * _ceil_to(c_blk, 8) * _ceil_to(HWo, 128) * dbytes
    xt_bytes = _ceil_to(HW, 8) * _ceil_to(c_blk, 128) * dbytes
    ph_bytes = _ceil_to(HWo, 8) * _ceil_to(c_blk, 128) * dbytes
    need = 2 * (in_tile + out_tile) + xt_bytes + ph_bytes
    vmem_limit = int(min(48 << 20, max(2 * need, 16 << 20)))

    kernel = functools.partial(_reorg_kernel, stride=s, width=W,
                               out_h=_h, out_w=_w)

    xv = x.reshape(B, C, HW)                              # zero-copy view
    out_v = pl.pallas_call(
        kernel,
        out_shape=jax.ShapeDtypeStruct((B, s, s, C, HWo), x.dtype),
        grid=(B, n_c),
        in_specs=[pl.BlockSpec((None, c_blk, HW), lambda b, ci: (b, ci, 0))],
        out_specs=pl.BlockSpec((None, s, s, c_blk, HWo),
                               lambda b, ci: (b, 0, 0, ci, 0)),
        scratch_shapes=[pltpu.VMEM((HW, c_blk), x.dtype),
                        pltpu.VMEM((HWo, c_blk), x.dtype)],
        compiler_params=pltpu.CompilerParams(
            dimension_semantics=("parallel", "parallel"),
            vmem_limit_bytes=vmem_limit),
        cost_estimate=pl.CostEstimate(
            flops=0, transcendentals=0,
            bytes_accessed=2 * x.size * dbytes),
    )(xv)

    # (B, s, s, C, _h*_w) -> (B, s*s*C, _h, _w): zero-copy reshape matching
    # PyTorch's channel order (sh*s + sw)*C + c.
    return out_v.reshape(B, s * s * C, _h, _w)


def reorg_layer(x, stride):
    """Pallas equivalent of reorg_layer.forward for NCHW input `x`."""
    B, C, H, W = x.shape
    assert H % stride == 0 and W % stride == 0
    if stride == 1:
        return x
    return _reorg_pallas(x, stride)


def reorg_reference(x, stride):
    """Direct transcription of the PyTorch forward (for verification)."""
    B, C, H, W = x.shape
    _h, _w = H // stride, W // stride
    y = x.reshape(B, C, _h, stride, _w, stride)
    y = jnp.transpose(y, (0, 1, 2, 4, 3, 5))
    y = y.reshape(B, C, _h * _w, stride * stride)
    y = jnp.transpose(y, (0, 1, 3, 2))
    y = y.reshape(B, C, stride * stride, _h, _w)
    y = jnp.transpose(y, (0, 2, 1, 3, 4))
    return y.reshape(B, -1, _h, _w)


if __name__ == "__main__":
    # reorg_layer has no parameters, so nothing to initialize.
    key = jax.random.PRNGKey(0)
    key1, key2 = jax.random.split(key)

    # Primary check: small shapes consistent with the module.
    B, C, H, W = 2, 4, 16, 16
    stride = 2
    x = jax.random.normal(key1, (B, C, H, W), dtype=jnp.float32)      # NCHW
    out = jax.block_until_ready(reorg_layer(x, stride))
    ref = reorg_reference(x, stride)
    assert out.shape == (B, C * stride * stride, H // stride, W // stride)
    assert out.dtype == x.dtype
    assert jnp.array_equal(out, ref), "Pallas reorg (stride=2) mismatch"

    # Secondary check: stride 3, non-power-of-two output tiles, C % 8 == 0.
    B2, C2, H2, W2, s2 = 1, 16, 18, 18, 3
    x2 = jax.random.normal(key2, (B2, C2, H2, W2), dtype=jnp.float32)
    out2 = jax.block_until_ready(reorg_layer(x2, s2))
    ref2 = reorg_reference(x2, s2)
    assert out2.shape == (B2, C2 * s2 * s2, H2 // s2, W2 // s2)
    assert jnp.array_equal(out2, ref2), "Pallas reorg (stride=3) mismatch"

    print("KERNEL_OK")
</pallas_src>

<mosaic_0001>
module attributes {stable_mosaic.version = 11 : i64} {
  func.func @_reorg_kernel(%arg0: i32, %arg1: i32, %arg2: memref<1x4x256xf32, #tpu.memory_space<vmem>>, %arg3: memref<1x2x2x4x64xf32, #tpu.memory_space<vmem>>, %arg4: memref<256x4xf32, #tpu.memory_space<vmem>>, %arg5: memref<64x4xf32, #tpu.memory_space<vmem>>) attributes {dimension_semantics = [#tpu.dimension_semantics<parallel>, #tpu.dimension_semantics<parallel>], iteration_bounds = array<i64: 2, 1>, scalar_prefetch = 0 : i64, scratch_operands = 2 : i64, tpu.core_type = #tpu.core_type<tc>, window_params = [{transform_indices = @transform_0, window_bounds = array<i64: 1, 4, 256>}, {transform_indices = @transform_1, window_bounds = array<i64: 1, 2, 2, 4, 64>}]} {
    %c0 = arith.constant 0 : index
    %c0_0 = arith.constant 0 : index
    %c0_1 = arith.constant 0 : index
    %0 = vector.load %arg2[%c0, %c0_0, %c0_1] : memref<1x4x256xf32, #tpu.memory_space<vmem>>, vector<1x4x256xf32>
    %1 = vector.shape_cast %0 : vector<1x4x256xf32> to vector<4x256xf32>
    %2 = tpu.transpose %1, [1, 0] : vector<4x256xf32> -> vector<256x4xf32>
    %c0_2 = arith.constant 0 : index
    %c0_3 = arith.constant 0 : index
    %3 = vector.load %arg4[%c0_2, %c0_3] : memref<256x4xf32, #tpu.memory_space<vmem>>, vector<256x4xf32>
    tpu.vector_store %arg4[%c0_2, %c0_3], %2 {strides = array<i32>} : memref<256x4xf32, #tpu.memory_space<vmem>>, vector<256x4xf32>,
    %c0_4 = arith.constant 0 : index
    %c0_5 = arith.constant 0 : index
    %4 = tpu.strided_load %arg4[%c0_4, %c0_5] {strides = array<i32: 2, 1>} : memref<256x4xf32, #tpu.memory_space<vmem>>, vector<8x4xf32>
    %c0_6 = arith.constant 0 : index
    %c0_7 = arith.constant 0 : index
    %5 = vector.load %arg5[%c0_6, %c0_7] : memref<64x4xf32, #tpu.memory_space<vmem>>, vector<8x4xf32>
    tpu.vector_store %arg5[%c0_6, %c0_7], %4 {strides = array<i32>} : memref<64x4xf32, #tpu.memory_space<vmem>>, vector<8x4xf32>,
    %c32 = arith.constant 32 : index
    %c0_8 = arith.constant 0 : index
    %6 = tpu.strided_load %arg4[%c32, %c0_8] {strides = array<i32: 2, 1>} : memref<256x4xf32, #tpu.memory_space<vmem>>, vector<8x4xf32>
    %c8 = arith.constant 8 : index
    %c0_9 = arith.constant 0 : index
    %7 = vector.load %arg5[%c8, %c0_9] : memref<64x4xf32, #tpu.memory_space<vmem>>, vector<8x4xf32>
    tpu.vector_store %arg5[%c8, %c0_9], %6 {strides = array<i32>} : memref<64x4xf32, #tpu.memory_space<vmem>>, vector<8x4xf32>,
    %c64 = arith.constant 64 : index
    %c0_10 = arith.constant 0 : index
    %8 = tpu.strided_load %arg4[%c64, %c0_10] {strides = array<i32: 2, 1>} : memref<256x4xf32, #tpu.memory_space<vmem>>, vector<8x4xf32>
    %c16 = arith.constant 16 : index
    %c0_11 = arith.constant 0 : index
    %9 = vector.load %arg5[%c16, %c0_11] : memref<64x4xf32, #tpu.memory_space<vmem>>, vector<8x4xf32>
    tpu.vector_store %arg5[%c16, %c0_11], %8 {strides = array<i32>} : memref<64x4xf32, #tpu.memory_space<vmem>>, vector<8x4xf32>,
    %c96 = arith.constant 96 : index
    %c0_12 = arith.constant 0 : index
    %10 = tpu.strided_load %arg4[%c96, %c0_12] {strides = array<i32: 2, 1>} : memref<256x4xf32, #tpu.memory_space<vmem>>, vector<8x4xf32>
    %c24 = arith.constant 24 : index
    %c0_13 = arith.constant 0 : index
    %11 = vector.load %arg5[%c24, %c0_13] : memref<64x4xf32, #tpu.memory_space<vmem>>, vector<8x4xf32>
    tpu.vector_store %arg5[%c24, %c0_13], %10 {strides = array<i32>} : memref<64x4xf32, #tpu.memory_space<vmem>>, vector<8x4xf32>,
    %c128 = arith.constant 128 : index
    %c0_14 = arith.constant 0 : index
    %12 = tpu.strided_load %arg4[%c128, %c0_14] {strides = array<i32: 2, 1>} : memref<256x4xf32, #tpu.memory_space<vmem>>, vector<8x4xf32>
    %c32_15 = arith.constant 32 : index
    %c0_16 = arith.constant 0 : index
    %13 = vector.load %arg5[%c32_15, %c0_16] : memref<64x4xf32, #tpu.memory_space<vmem>>, vector<8x4xf32>
    tpu.vector_store %arg5[%c32_15, %c0_16], %12 {strides = array<i32>} : memref<64x4xf32, #tpu.memory_space<vmem>>, vector<8x4xf32>,
    %c160 = arith.constant 160 : index
    %c0_17 = arith.constant 0 : index
    %14 = tpu.strided_load %arg4[%c160, %c0_17] {strides = array<i32: 2, 1>} : memref<256x4xf32, #tpu.memory_space<vmem>>, vector<8x4xf32>
    %c40 = arith.constant 40 : index
    %c0_18 = arith.constant 0 : index
    %15 = vector.load %arg5[%c40, %c0_18] : memref<64x4xf32, #tpu.memory_space<vmem>>, vector<8x4xf32>
    tpu.vector_store %arg5[%c40, %c0_18], %14 {strides = array<i32>} : memref<64x4xf32, #tpu.memory_space<vmem>>, vector<8x4xf32>,
    %c192 = arith.constant 192 : index
    %c0_19 = arith.constant 0 : index
    %16 = tpu.strided_load %arg4[%c192, %c0_19] {strides = array<i32: 2, 1>} : memref<256x4xf32, #tpu.memory_space<vmem>>, vector<8x4xf32>
    %c48 = arith.constant 48 : index
    %c0_20 = arith.constant 0 : index
    %17 = vector.load %arg5[%c48, %c0_20] : memref<64x4xf32, #tpu.memory_space<vmem>>, vector<8x4xf32>
    tpu.vector_store %arg5[%c48, %c0_20], %16 {strides = array<i32>} : memref<64x4xf32, #tpu.memory_space<vmem>>, vector<8x4xf32>,
    %c224 = arith.constant 224 : index
    %c0_21 = arith.constant 0 : index
    %18 = tpu.strided_load %arg4[%c224, %c0_21] {strides = array<i32: 2, 1>} : memref<256x4xf32, #tpu.memory_space<vmem>>, vector<8x4xf32>
    %c56 = arith.constant 56 : index
    %c0_22 = arith.constant 0 : index
    %19 = vector.load %arg5[%c56, %c0_22] : memref<64x4xf32, #tpu.memory_space<vmem>>, vector<8x4xf32>
    tpu.vector_store %arg5[%c56, %c0_22], %18 {strides = array<i32>} : memref<64x4xf32, #tpu.memory_space<vmem>>, vector<8x4xf32>,
    %c0_23 = arith.constant 0 : index
    %c0_24 = arith.constant 0 : index
    %20 = vector.load %arg5[%c0_23, %c0_24] : memref<64x4xf32, #tpu.memory_space<vmem>>, vector<64x4xf32>
    %21 = tpu.transpose %20, [1, 0] : vector<64x4xf32> -> vector<4x64xf32>
    %c0_25 = arith.constant 0 : index
    %c0_26 = arith.constant 0 : index
    %c0_27 = arith.constant 0 : index
    %c0_28 = arith.constant 0 : index
    %c0_29 = arith.constant 0 : index
    %22 = vector.load %arg3[%c0_25, %c0_26, %c0_27, %c0_28, %c0_29] : memref<1x2x2x4x64xf32, #tpu.memory_space<vmem>>, vector<1x1x1x4x64xf32>
    %23 = vector.shape_cast %22 : vector<1x1x1x4x64xf32> to vector<4x64xf32>
    %24 = vector.shape_cast %21 : vector<4x64xf32> to vector<1x1x1x4x64xf32>
    tpu.vector_store %arg3[%c0_25, %c0_26, %c0_27, %c0_28, %c0_29], %24 {strides = array<i32>} : memref<1x2x2x4x64xf32, #tpu.memory_space<vmem>>, vector<1x1x1x4x64xf32>,
    %c1 = arith.constant 1 : index
    %c0_30 = arith.constant 0 : index
    %25 = tpu.strided_load %arg4[%c1, %c0_30] {strides = array<i32: 2, 1>} : memref<256x4xf32, #tpu.memory_space<vmem>>, vector<8x4xf32>
    %c0_31 = arith.constant 0 : index
    %c0_32 = arith.constant 0 : index
    %26 = vector.load %arg5[%c0_31, %c0_32] : memref<64x4xf32, #tpu.memory_space<vmem>>, vector<8x4xf32>
    tpu.vector_store %arg5[%c0_31, %c0_32], %25 {strides = array<i32>} : memref<64x4xf32, #tpu.memory_space<vmem>>, vector<8x4xf32>,
    %c33 = arith.constant 33 : index
    %c0_33 = arith.constant 0 : index
    %27 = tpu.strided_load %arg4[%c33, %c0_33] {strides = array<i32: 2, 1>} : memref<256x4xf32, #tpu.memory_space<vmem>>, vector<8x4xf32>
    %c8_34 = arith.constant 8 : index
    %c0_35 = arith.constant 0 : index
    %28 = vector.load %arg5[%c8_34, %c0_35] : memref<64x4xf32, #tpu.memory_space<vmem>>, vector<8x4xf32>
    tpu.vector_store %arg5[%c8_34, %c0_35], %27 {strides = array<i32>} : memref<64x4xf32, #tpu.memory_space<vmem>>, vector<8x4xf32>,
    %c65 = arith.constant 65 : index
    %c0_36 = arith.constant 0 : index
    %29 = tpu.strided_load %arg4[%c65, %c0_36] {strides = array<i32: 2, 1>} : memref<256x4xf32, #tpu.memory_space<vmem>>, vector<8x4xf32>
    %c16_37 = arith.constant 16 : index
    %c0_38 = arith.constant 0 : index
    %30 = vector.load %arg5[%c16_37, %c0_38] : memref<64x4xf32, #tpu.memory_space<vmem>>, vector<8x4xf32>
    tpu.vector_store %arg5[%c16_37, %c0_38], %29 {strides = array<i32>} : memref<64x4xf32, #tpu.memory_space<vmem>>, vector<8x4xf32>,
    %c97 = arith.constant 97 : index
    %c0_39 = arith.constant 0 : index
    %31 = tpu.strided_load %arg4[%c97, %c0_39] {strides = array<i32: 2, 1>} : memref<256x4xf32, #tpu.memory_space<vmem>>, vector<8x4xf32>
    %c24_40 = arith.constant 24 : index
    %c0_41 = arith.constant 0 : index
    %32 = vector.load %arg5[%c24_40, %c0_41] : memref<64x4xf32, #tpu.memory_space<vmem>>, vector<8x4xf32>
    tpu.vector_store %arg5[%c24_40, %c0_41], %31 {strides = array<i32>} : memref<64x4xf32, #tpu.memory_space<vmem>>, vector<8x4xf32>,
    %c129 = arith.constant 129 : index
    %c0_42 = arith.constant 0 : index
    %33 = tpu.strided_load %arg4[%c129, %c0_42] {strides = array<i32: 2, 1>} : memref<256x4xf32, #tpu.memory_space<vmem>>, vector<8x4xf32>
    %c32_43 = arith.constant 32 : index
    %c0_44 = arith.constant 0 : index
    %34 = vector.load %arg5[%c32_43, %c0_44] : memref<64x4xf32, #tpu.memory_space<vmem>>, vector<8x4xf32>
    tpu.vector_store %arg5[%c32_43, %c0_44], %33 {strides = array<i32>} : memref<64x4xf32, #tpu.memory_space<vmem>>, vector<8x4xf32>,
    %c161 = arith.constant 161 : index
    %c0_45 = arith.constant 0 : index
    %35 = tpu.strided_load %arg4[%c161, %c0_45] {strides = array<i32: 2, 1>} : memref<256x4xf32, #tpu.memory_space<vmem>>, vector<8x4xf32>
    %c40_46 = arith.constant 40 : index
    %c0_47 = arith.constant 0 : index
    %36 = vector.load %arg5[%c40_46, %c0_47] : memref<64x4xf32, #tpu.memory_space<vmem>>, vector<8x4xf32>
    tpu.vector_store %arg5[%c40_46, %c0_47], %35 {strides = array<i32>} : memref<64x4xf32, #tpu.memory_space<vmem>>, vector<8x4xf32>,
    %c193 = arith.constant 193 : index
    %c0_48 = arith.constant 0 : index
    %37 = tpu.strided_load %arg4[%c193, %c0_48] {strides = array<i32: 2, 1>} : memref<256x4xf32, #tpu.memory_space<vmem>>, vector<8x4xf32>
    %c48_49 = arith.constant 48 : index
    %c0_50 = arith.constant 0 : index
    %38 = vector.load %arg5[%c48_49, %c0_50] : memref<64x4xf32, #tpu.memory_space<vmem>>, vector<8x4xf32>
    tpu.vector_store %arg5[%c48_49, %c0_50], %37 {strides = array<i32>} : memref<64x4xf32, #tpu.memory_space<vmem>>, vector<8x4xf32>,
    %c225 = arith.constant 225 : index
    %c0_51 = arith.constant 0 : index
    %39 = tpu.strided_load %arg4[%c225, %c0_51] {strides = array<i32: 2, 1>} : memref<256x4xf32, #tpu.memory_space<vmem>>, vector<8x4xf32>
    %c56_52 = arith.constant 56 : index
    %c0_53 = arith.constant 0 : index
    %40 = vector.load %arg5[%c56_52, %c0_53] : memref<64x4xf32, #tpu.memory_space<vmem>>, vector<8x4xf32>
    tpu.vector_store %arg5[%c56_52, %c0_53], %39 {strides = array<i32>} : memref<64x4xf32, #tpu.memory_space<vmem>>, vector<8x4xf32>,
    %c0_54 = arith.constant 0 : index
    %c0_55 = arith.constant 0 : index
    %41 = vector.load %arg5[%c0_54, %c0_55] : memref<64x4xf32, #tpu.memory_space<vmem>>, vector<64x4xf32>
    %42 = tpu.transpose %41, [1, 0] : vector<64x4xf32> -> vector<4x64xf32>
    %c0_56 = arith.constant 0 : index
    %c0_57 = arith.constant 0 : index
    %c1_58 = arith.constant 1 : index
    %c0_59 = arith.constant 0 : index
    %c0_60 = arith.constant 0 : index
    %43 = vector.load %arg3[%c0_56, %c0_57, %c1_58, %c0_59, %c0_60] : memref<1x2x2x4x64xf32, #tpu.memory_space<vmem>>, vector<1x1x1x4x64xf32>
    %44 = vector.shape_cast %43 : vector<1x1x1x4x64xf32> to vector<4x64xf32>
    %45 = vector.shape_cast %42 : vector<4x64xf32> to vector<1x1x1x4x64xf32>
    tpu.vector_store %arg3[%c0_56, %c0_57, %c1_58, %c0_59, %c0_60], %45 {strides = array<i32>} : memref<1x2x2x4x64xf32, #tpu.memory_space<vmem>>, vector<1x1x1x4x64xf32>,
    %c16_61 = arith.constant 16 : index
    %c0_62 = arith.constant 0 : index
    %46 = tpu.strided_load %arg4[%c16_61, %c0_62] {strides = array<i32: 2, 1>} : memref<256x4xf32, #tpu.memory_space<vmem>>, vector<8x4xf32>
    %c0_63 = arith.constant 0 : index
    %c0_64 = arith.constant 0 : index
    %47 = vector.load %arg5[%c0_63, %c0_64] : memref<64x4xf32, #tpu.memory_space<vmem>>, vector<8x4xf32>
    tpu.vector_store %arg5[%c0_63, %c0_64], %46 {strides = array<i32>} : memref<64x4xf32, #tpu.memory_space<vmem>>, vector<8x4xf32>,
    %c48_65 = arith.constant 48 : index
    %c0_66 = arith.constant 0 : index
    %48 = tpu.strided_load %arg4[%c48_65, %c0_66] {strides = array<i32: 2, 1>} : memref<256x4xf32, #tpu.memory_space<vmem>>, vector<8x4xf32>
    %c8_67 = arith.constant 8 : index
    %c0_68 = arith.constant 0 : index
    %49 = vector.load %arg5[%c8_67, %c0_68] : memref<64x4xf32, #tpu.memory_space<vmem>>, vector<8x4xf32>
    tpu.vector_store %arg5[%c8_67, %c0_68], %48 {strides = array<i32>} : memref<64x4xf32, #tpu.memory_space<vmem>>, vector<8x4xf32>,
    %c80 = arith.constant 80 : index
    %c0_69 = arith.constant 0 : index
    %50 = tpu.strided_load %arg4[%c80, %c0_69] {strides = array<i32: 2, 1>} : memref<256x4xf32, #tpu.memory_space<vmem>>, vector<8x4xf32>
    %c16_70 = arith.constant 16 : index
    %c0_71 = arith.constant 0 : index
    %51 = vector.load %arg5[%c16_70, %c0_71] : memref<64x4xf32, #tpu.memory_space<vmem>>, vector<8x4xf32>
    tpu.vector_store %arg5[%c16_70, %c0_71], %50 {strides = array<i32>} : memref<64x4xf32, #tpu.memory_space<vmem>>, vector<8x4xf32>,
    %c112 = arith.constant 112 : index
    %c0_72 = arith.constant 0 : index
    %52 = tpu.strided_load %arg4[%c112, %c0_72] {strides = array<i32: 2, 1>} : memref<256x4xf32, #tpu.memory_space<vmem>>, vector<8x4xf32>
    %c24_73 = arith.constant 24 : index
    %c0_74 = arith.constant 0 : index
    %53 = vector.load %arg5[%c24_73, %c0_74] : memref<64x4xf32, #tpu.memory_space<vmem>>, vector<8x4xf32>
    tpu.vector_store %arg5[%c24_73, %c0_74], %52 {strides = array<i32>} : memref<64x4xf32, #tpu.memory_space<vmem>>, vector<8x4xf32>,
    %c144 = arith.constant 144 : index
    %c0_75 = arith.constant 0 : index
    %54 = tpu.strided_load %arg4[%c144, %c0_75] {strides = array<i32: 2, 1>} : memref<256x4xf32, #tpu.memory_space<vmem>>, vector<8x4xf32>
    %c32_76 = arith.constant 32 : index
    %c0_77 = arith.constant 0 : index
    %55 = vector.load %arg5[%c32_76, %c0_77] : memref<64x4xf32, #tpu.memory_space<vmem>>, vector<8x4xf32>
    tpu.vector_store %arg5[%c32_76, %c0_77], %54 {strides = array<i32>} : memref<64x4xf32, #tpu.memory_space<vmem>>, vector<8x4xf32>,
    %c176 = arith.constant 176 : index
    %c0_78 = arith.constant 0 : index
    %56 = tpu.strided_load %arg4[%c176, %c0_78] {strides = array<i32: 2, 1>} : memref<256x4xf32, #tpu.memory_space<vmem>>, vector<8x4xf32>
    %c40_79 = arith.constant 40 : index
    %c0_80 = arith.constant 0 : index
    %57 = vector.load %arg5[%c40_79, %c0_80] : memref<64x4xf32, #tpu.memory_space<vmem>>, vector<8x4xf32>
    tpu.vector_store %arg5[%c40_79, %c0_80], %56 {strides = array<i32>} : memref<64x4xf32, #tpu.memory_space<vmem>>, vector<8x4xf32>,
    %c208 = arith.constant 208 : index
    %c0_81 = arith.constant 0 : index
    %58 = tpu.strided_load %arg4[%c208, %c0_81] {strides = array<i32: 2, 1>} : memref<256x4xf32, #tpu.memory_space<vmem>>, vector<8x4xf32>
    %c48_82 = arith.constant 48 : index
    %c0_83 = arith.constant 0 : index
    %59 = vector.load %arg5[%c48_82, %c0_83] : memref<64x4xf32, #tpu.memory_space<vmem>>, vector<8x4xf32>
    tpu.vector_store %arg5[%c48_82, %c0_83], %58 {strides = array<i32>} : memref<64x4xf32, #tpu.memory_space<vmem>>, vector<8x4xf32>,
    %c240 = arith.constant 240 : index
    %c0_84 = arith.constant 0 : index
    %60 = tpu.strided_load %arg4[%c240, %c0_84] {strides = array<i32: 2, 1>} : memref<256x4xf32, #tpu.memory_space<vmem>>, vector<8x4xf32>
    %c56_85 = arith.constant 56 : index
    %c0_86 = arith.constant 0 : index
    %61 = vector.load %arg5[%c56_85, %c0_86] : memref<64x4xf32, #tpu.memory_space<vmem>>, vector<8x4xf32>
    tpu.vector_store %arg5[%c56_85, %c0_86], %60 {strides = array<i32>} : memref<64x4xf32, #tpu.memory_space<vmem>>, vector<8x4xf32>,
    %c0_87 = arith.constant 0 : index
    %c0_88 = arith.constant 0 : index
    %62 = vector.load %arg5[%c0_87, %c0_88] : memref<64x4xf32, #tpu.memory_space<vmem>>, vector<64x4xf32>
    %63 = tpu.transpose %62, [1, 0] : vector<64x4xf32> -> vector<4x64xf32>
    %c0_89 = arith.constant 0 : index
    %c1_90 = arith.constant 1 : index
    %c0_91 = arith.constant 0 : index
    %c0_92 = arith.constant 0 : index
    %c0_93 = arith.constant 0 : index
    %64 = vector.load %arg3[%c0_89, %c1_90, %c0_91, %c0_92, %c0_93] : memref<1x2x2x4x64xf32, #tpu.memory_space<vmem>>, vector<1x1x1x4x64xf32>
    %65 = vector.shape_cast %64 : vector<1x1x1x4x64xf32> to vector<4x64xf32>
    %66 = vector.shape_cast %63 : vector<4x64xf32> to vector<1x1x1x4x64xf32>
    tpu.vector_store %arg3[%c0_89, %c1_90, %c0_91, %c0_92, %c0_93], %66 {strides = array<i32>} : memref<1x2x2x4x64xf32, #tpu.memory_space<vmem>>, vector<1x1x1x4x64xf32>,
    %c17 = arith.constant 17 : index
    %c0_94 = arith.constant 0 : index
    %67 = tpu.strided_load %arg4[%c17, %c0_94] {strides = array<i32: 2, 1>} : memref<256x4xf32, #tpu.memory_space<vmem>>, vector<8x4xf32>
    %c0_95 = arith.constant 0 : index
    %c0_96 = arith.constant 0 : index
    %68 = vector.load %arg5[%c0_95, %c0_96] : memref<64x4xf32, #tpu.memory_space<vmem>>, vector<8x4xf32>
    tpu.vector_store %arg5[%c0_95, %c0_96], %67 {strides = array<i32>} : memref<64x4xf32, #tpu.memory_space<vmem>>, vector<8x4xf32>,
    %c49 = arith.constant 49 : index
    %c0_97 = arith.constant 0 : index
    %69 = tpu.strided_load %arg4[%c49, %c0_97] {strides = array<i32: 2, 1>} : memref<256x4xf32, #tpu.memory_space<vmem>>, vector<8x4xf32>
    %c8_98 = arith.constant 8 : index
    %c0_99 = arith.constant 0 : index
    %70 = vector.load %arg5[%c8_98, %c0_99] : memref<64x4xf32, #tpu.memory_space<vmem>>, vector<8x4xf32>
    tpu.vector_store %arg5[%c8_98, %c0_99], %69 {strides = array<i32>} : memref<64x4xf32, #tpu.memory_space<vmem>>, vector<8x4xf32>,
    %c81 = arith.constant 81 : index
    %c0_100 = arith.constant 0 : index
    %71 = tpu.strided_load %arg4[%c81, %c0_100] {strides = array<i32: 2, 1>} : memref<256x4xf32, #tpu.memory_space<vmem>>, vector<8x4xf32>
    %c16_101 = arith.constant 16 : index
    %c0_102 = arith.constant 0 : index
    %72 = vector.load %arg5[%c16_101, %c0_102] : memref<64x4xf32, #tpu.memory_space<vmem>>, vector<8x4xf32>
    tpu.vector_store %arg5[%c16_101, %c0_102], %71 {strides = array<i32>} : memref<64x4xf32, #tpu.memory_space<vmem>>, vector<8x4xf32>,
    %c113 = arith.constant 113 : index
    %c0_103 = arith.constant 0 : index
    %73 = tpu.strided_load %arg4[%c113, %c0_103] {strides = array<i32: 2, 1>} : memref<256x4xf32, #tpu.memory_space<vmem>>, vector<8x4xf32>
    %c24_104 = arith.constant 24 : index
    %c0_105 = arith.constant 0 : index
    %74 = vector.load %arg5[%c24_104, %c0_105] : memref<64x4xf32, #tpu.memory_space<vmem>>, vector<8x4xf32>
    tpu.vector_store %arg5[%c24_104, %c0_105], %73 {strides = array<i32>} : memref<64x4xf32, #tpu.memory_space<vmem>>, vector<8x4xf32>,
    %c145 = arith.constant 145 : index
    %c0_106 = arith.constant 0 : index
    %75 = tpu.strided_load %arg4[%c145, %c0_106] {strides = array<i32: 2, 1>} : memref<256x4xf32, #tpu.memory_space<vmem>>, vector<8x4xf32>
    %c32_107 = arith.constant 32 : index
    %c0_108 = arith.constant 0 : index
    %76 = vector.load %arg5[%c32_107, %c0_108] : memref<64x4xf32, #tpu.memory_space<vmem>>, vector<8x4xf32>
    tpu.vector_store %arg5[%c32_107, %c0_108], %75 {strides = array<i32>} : memref<64x4xf32, #tpu.memory_space<vmem>>, vector<8x4xf32>,
    %c177 = arith.constant 177 : index
    %c0_109 = arith.constant 0 : index
    %77 = tpu.strided_load %arg4[%c177, %c0_109] {strides = array<i32: 2, 1>} : memref<256x4xf32, #tpu.memory_space<vmem>>, vector<8x4xf32>
    %c40_110 = arith.constant 40 : index
    %c0_111 = arith.constant 0 : index
    %78 = vector.load %arg5[%c40_110, %c0_111] : memref<64x4xf32, #tpu.memory_space<vmem>>, vector<8x4xf32>
    tpu.vector_store %arg5[%c40_110, %c0_111], %77 {strides = array<i32>} : memref<64x4xf32, #tpu.memory_space<vmem>>, vector<8x4xf32>,
    %c209 = arith.constant 209 : index
    %c0_112 = arith.constant 0 : index
    %79 = tpu.strided_load %arg4[%c209, %c0_112] {strides = array<i32: 2, 1>} : memref<256x4xf32, #tpu.memory_space<vmem>>, vector<8x4xf32>
    %c48_113 = arith.constant 48 : index
    %c0_114 = arith.constant 0 : index
    %80 = vector.load %arg5[%c48_113, %c0_114] : memref<64x4xf32, #tpu.memory_space<vmem>>, vector<8x4xf32>
    tpu.vector_store %arg5[%c48_113, %c0_114], %79 {strides = array<i32>} : memref<64x4xf32, #tpu.memory_space<vmem>>, vector<8x4xf32>,
    %c241 = arith.constant 241 : index
    %c0_115 = arith.constant 0 : index
    %81 = tpu.strided_load %arg4[%c241, %c0_115] {strides = array<i32: 2, 1>} : memref<256x4xf32, #tpu.memory_space<vmem>>, vector<8x4xf32>
    %c56_116 = arith.constant 56 : index
    %c0_117 = arith.constant 0 : index
    %82 = vector.load %arg5[%c56_116, %c0_117] : memref<64x4xf32, #tpu.memory_space<vmem>>, vector<8x4xf32>
    tpu.vector_store %arg5[%c56_116, %c0_117], %81 {strides = array<i32>} : memref<64x4xf32, #tpu.memory_space<vmem>>, vector<8x4xf32>,
    %c0_118 = arith.constant 0 : index
    %c0_119 = arith.constant 0 : index
    %83 = vector.load %arg5[%c0_118, %c0_119] : memref<64x4xf32, #tpu.memory_space<vmem>>, vector<64x4xf32>
    %84 = tpu.transpose %83, [1, 0] : vector<64x4xf32> -> vector<4x64xf32>
    %c0_120 = arith.constant 0 : index
    %c1_121 = arith.constant 1 : index
    %c1_122 = arith.constant 1 : index
    %c0_123 = arith.constant 0 : index
    %c0_124 = arith.constant 0 : index
    %85 = vector.load %arg3[%c0_120, %c1_121, %c1_122, %c0_123, %c0_124] : memref<1x2x2x4x64xf32, #tpu.memory_space<vmem>>, vector<1x1x1x4x64xf32>
    %86 = vector.shape_cast %85 : vector<1x1x1x4x64xf32> to vector<4x64xf32>
    %87 = vector.shape_cast %84 : vector<4x64xf32> to vector<1x1x1x4x64xf32>
    tpu.vector_store %arg3[%c0_120, %c1_121, %c1_122, %c0_123, %c0_124], %87 {strides = array<i32>} : memref<1x2x2x4x64xf32, #tpu.memory_space<vmem>>, vector<1x1x1x4x64xf32>,
    return
  }
  func.func @transform_0(%arg0: i32, %arg1: i32) -> (i32, i32, i32) {
    %c0_i32 = arith.constant 0 : i32
    %c0_i32_0 = arith.constant 0 : i32
    return %arg0, %arg1, %c0_i32 : i32, i32, i32
  }
  func.func @transform_1(%arg0: i32, %arg1: i32) -> (i32, i32, i32, i32, i32) {
    %c0_i32 = arith.constant 0 : i32
    %c0_i32_0 = arith.constant 0 : i32
    %c0_i32_1 = arith.constant 0 : i32
    %c0_i32_2 = arith.constant 0 : i32
    return %arg0, %c0_i32, %c0_i32_0, %arg1, %c0_i32_1 : i32, i32, i32, i32, i32
  }
}

</mosaic_0001>

<bundles_post_ra>
// kernel: tpu_custom_call.1
= control target key start
LH: loop header
LB: loop body
LE: loop exit
PB: predicated region body
PF: predicated region fallthrough
CT: control target
= control target key end

     0   :  { %6 = vsyncpa [#allocation5], 0  ;;  %s1034_s0 = inlined_call_operand.hbm [shape: f32[2,4,256], index: 0, kind: input, shape index: {}]   ;;  %s1035_s1 = inlined_call_operand.hbm [shape: f32[2,2,2,4,64], index: 1, kind: output, shape index: {}]  }
   0x1   :  { %8 = vsyncpa [#allocation5 + $0x1], 0 }
   0x2   :  { %9 = vsyncpa [#allocation6], 0 }
   0x3   :  { %11 = vsyncpa [#allocation6 + $0x1], 0  ;;  %s834_s6 = smov 0   ;;  %s836_s7 = smov 0  }
   0x4   :  { %s838_s8 = smov 0   ;;  %s840_s9 = smov 0  }
   0x5   :  { %s842_s10 = smov 0   ;;  %s844_s11 = smov 0  }
   0x6 LB: > { %s623_s12 = sadd.s32 4294967295, %s820_s11   ;;  %s624_s13 = sadd.s32 4294967294, %s820_s11   ;;  %s820_s11 = sphi %s844_s11, %s17_s11   ;;  %s816_s10 = sphi %s842_s10, %s1044_s10   ;;  %s812_s9 = sphi %s840_s9, %s1043_s9   ;;  %s808_s8 = sphi %s838_s8, %s1042_s8   ;;  %s804_s7 = sphi %s836_s7, %s1041_s7   ;;  %s800_s6 = sphi %s834_s6, %s1040_s6  }
   0x7   : > { %s29_s14 = sadd.s32 1, %s816_s10  ;;  %s38_s15 = sadd.s32 1, %s808_s8 }
   0x8   : > { %p31_p0 = scmp.ge.s32.totalorder %s29_s14, 2  ;;  %p45_p1 = scmp.ne.s32.totalorder %s808_s8, %s804_s7 }
   0x9   : > { %p46_p2 = scmp.eq.s32.totalorder %s820_s11, 0  ;;  %p51_p3 = scmp.ne.s32.totalorder %s804_s7, %s800_s6 }
   0xa   : > { %s1046_s14 = smov (%p31_p0, %s29_s14), 0  ;;  %p52_p5 = scmp.eq.s32.totalorder %s623_s12, 0 }
   0xb   : > { %p875_p4 = por %p46_p2, %p45_p1  ;;  %s33_s17 = ssub.s32 %s816_s10, %s1046_s14 }
   0xc   : > { %p77_p6 = scmp.eq.s32.totalorder %s623_s12, 1  ;;  %p36_p7 = scmp.eq.s32.totalorder %s33_s17, 0 }
   0xd   : > { %p881_p8 = por %p52_p5, %p51_p3  ;;  %p83_p10 = scmp.eq.s32.totalorder %s624_s13, 1 }
   0xe   : > { %p885_p9 = por %p77_p6, %p45_p1  ;;  %p626_p12 = scmp.ge.s32.totalorder %s820_s11, 2 }
   0xf   : > { %s890_s20 = scalar_select %p36_p7, %s808_s8, %s38_s15  }
  0x10   : > { %p892_p11 = por %p83_p10, %p51_p3  ;;  %p655_p13 = scmp.lt.s32.totalorder %s820_s11, 2 }
  0x11   : > { %s103_s22 = sand.u32 1, %s808_s8   ;;  %s641_s24 = sshll.u32 %s816_s10, 3 }
  0x12   : > { %s627_s23 = sshll.u32 %s103_s22, 3  ;;  %s114_s27 = scalar_lea.hbm %s1034_s0, %s641_s24 }
  0x13   : > { %s107_s28 = scalar_lea.vmem [#allocation4], %s627_s23  ;;  %s116_s30 = sshll.u32 %s114_s27, 4  ;;  %s117_s30 = int_to_ptr.hbm [resolvable:$true] %s116_s30 }
  0x14   : > { %s118_s29 = sshll.u32 %s107_s28, 4  ;;  %p648_p0 = pnand %p655_p13, %p875_p4  ;;  %s119_s29 = int_to_ptr.vmem [resolvable:$true] %s118_s29 }
  0x15   : > { %p630_p1 = scmp.ge.s32.totalorder %s820_s11, 1  ;;  %p123_p2 = scmp.lt.s32.totalorder %s820_s11, 3 }
  0x16   : > { %s104_s2 = scalar_lea.sflag [#allocation5], %s103_s22 }
  0x17   : > { %650 = dma.hbm_to_vmem [thread:$0]  (!%p648_p0), %s117_s30, 128, %s119_s29, %s104_s2  }
  0x18   : > { %p124_p3 = pnand %p630_p1, %p123_p2 }
  0x19   : > { %s908_s3 = sand.u32 (!%p124_p3), 1, %s804_s7  }
  0x1a   : > { %127 = sbr.rel (%p124_p3) target bundleno = 631 (0x277), region = 24  ;;  %s631_s4 = sshll.u32 (!%p124_p3), %s908_s3, 3 }
  0x1b   : > { %s130_s5 = scalar_lea.sflag (!%p124_p3), [#allocation5], %s908_s3  ;;  %s133_s12 = scalar_lea.vmem (!%p124_p3), [#allocation4], %s631_s4 }
  0x1f   : > { %791 = dma.done.wait (%p881_p8), %s130_s5, 128  }
  0x20   : > { %793 = vsyncadd (%p881_p8), %s130_s5, 4294967168  ;;  %v153_v0 = vld [vmem:[%s133_s12] sm:$0xff]  ;;  %vm224_vm0 = vcmask 31744   ;;  %s632_s13 = sshll.u32 %s908_s3, 4  ;;  %vm320_vm1 = vcmask 519168   ;;  %s642_s16 = sshll.u32 %s812_s9, 4 }
  0x21   : > { %155 = vst [vmem:[#allocation1] ss:$2 sm:$0xff] %v153_v0  ;;  %s152_s15 = scalar_lea.vmem [#allocation7], %s632_s13  ;;  %s533_s22 = scalar_lea.hbm %s1035_s1, %s642_s16 }
  0x22   : > { %s534_s23 = sshll.u32 %s152_s15, 4  ;;  %s536_s24 = sshll.u32 %s533_s22, 4  ;;  %s535_s23 = int_to_ptr.vmem [resolvable:$true] %s534_s23  ;;  %s537_s24 = int_to_ptr.hbm [resolvable:$true] %s536_s24 }
  0x23   : > { %s521_s25 = scalar_lea.sflag [#allocation6], %s908_s3  ;;  %s752_s26 = sshra.s32 %s537_s24, 4  ;;  %s753_s26 = int_to_ptr.hbm [resolvable:$true] %s752_s26 }
  0x24   : > { %s754_s27 = scalar_lea.hbm %s753_s26, 16  ;;  %s758_s29 = scalar_lea.hbm %s1035_s1, 32 }
  0x25   : > { %p755_p4 = scmp.ne.s32.totalorder %s753_s26, %s754_s27  ;;  %p759_p7 = scmp.lt.s32.totalorder %s753_s26, %s1035_s1 }
  0x26   : > { %p760_p8 = scmp.lt.s32.totalorder %s758_s29, %s754_s27 }
  0x27   : > { %p756_p5 = pnand %p755_p4, %p885_p9 }
  0x28   : > { %v156_v1 = vld.sshfl [vmem:[#allocation1] sm:$0xff pattern:$0x75316420]  ;;  %v157_v2 = vld.sshfl [vmem:[#allocation1 + $0x8] sm:$0xff pattern:$0x75316420]  ;;  %p761_p10 = por %p760_p8, %p759_p7 }
  0x29   : > { %160 = vxpose.xlu0.b32.start.end [1/1] (short) %v156_v1, 128  ;;  %p757_p6 = pneg %p756_p5 }
  0x2b   : > { %p762_p13 = pnand %p761_p10, %p757_p6 }
  0xa9   : > { %192 = vxpose.xlu0.b32.start.end [1/1] (short) %v157_v2, 128 }
  0xcd   : > { %v176_v3 = vpop.trf.xlu0 }
  0xce   : > { %225 = vst.msk [vmem:[#allocation2] sm:$0xff] %vm224_vm0, %v176_v3 }
  0xd5   : > { %v177_v4 = vpop.trf.xlu0 }
  0xd6   : > { %226 = vst.msk [vmem:[#allocation2 + $0x8] sm:$0xff] %vm224_vm0, %v177_v4 }
  0xdd   : > { %v178_v5 = vpop.trf.xlu0  ;;  %v257_v6 = vld [vmem:[#allocation2] ss:$2 sm:$0xff]  ;;  %v323_v9 = vld [vmem:[#allocation2 + $0x1] ss:$2 sm:$0xff] }
  0xde   : > { %227 = vst.msk [vmem:[#allocation2 + $0x10] sm:$0xff] %vm224_vm0, %v178_v5 }
  0xdf   : > { %258 = vst.msk [vmem:[#allocation3] sm:$0xff] %vm224_vm0, %v257_v6 }
  0xe5   : > { %v179_v7 = vpop.trf.xlu0 }
  0xe6   : > { %228 = vst.msk [vmem:[#allocation2 + $0x18] sm:$0xff] %vm224_vm0, %v179_v7  ;;  %v280_v8 = vld [vmem:[#allocation3] sm:$0xff] }
  0xe7   : > { %288 = vxpose.xlu1.b32.start [1/8] (short) (narrow) %v280_v8, 8  ;;  %324 = vst.msk [vmem:[#allocation3] sm:$0xff] %vm224_vm0, %v323_v9 }
  0xed   : > { %v180_v10 = vpop.trf.xlu0  ;;  %v389_v11 = vld [vmem:[#allocation2 + $0x10] ss:$2 sm:$0xff]  ;;  %v455_v15 = vld [vmem:[#allocation2 + $0x11] ss:$2 sm:$0xff] }
  0xee   : > { %229 = vst.msk [vmem:[#allocation2 + $0x20] sm:$0xff] %vm224_vm0, %v180_v10  ;;  %v346_v12 = vld [vmem:[#allocation3] sm:$0xff] }
  0xef   : > { %354 = vxpose.xlu2.b32.start [1/8] (short) (narrow) %v346_v12, 8  ;;  %390 = vst.msk [vmem:[#allocation3] sm:$0xff] %vm224_vm0, %v389_v11 }
  0xf5   : > { %v181_v13 = vpop.trf.xlu0 }
  0xf6   : > { %230 = vst.msk [vmem:[#allocation2 + $0x28] sm:$0xff] %vm224_vm0, %v181_v13  ;;  %v925_v14 = vld [vmem:[#allocation3] sm:$0xff] }
  0xf7   : > { %456 = vst.msk [vmem:[#allocation3] sm:$0xff] %vm224_vm0, %v455_v15 }
  0xfd   : > { %v182_v16 = vpop.trf.xlu0  ;;  %v260_v17 = vld [vmem:[#allocation2 + $0x20] ss:$2 sm:$0xff]  ;;  %v326_v20 = vld [vmem:[#allocation2 + $0x21] ss:$2 sm:$0xff] }
  0xfe   : > { %231 = vst.msk [vmem:[#allocation2 + $0x30] sm:$0xff] %vm224_vm0, %v182_v16 }
  0xff   : > { %261 = vst.msk [vmem:[#allocation3 + $0x8] sm:$0xff] %vm224_vm0, %v260_v17 }
 0x105   : > { %v183_v18 = vpop.trf.xlu0 }
 0x106   : > { %232 = vst.msk [vmem:[#allocation2 + $0x38] sm:$0xff] %vm224_vm0, %v183_v18  ;;  %v281_v19 = vld [vmem:[#allocation3 + $0x8] sm:$0xff] }
 0x107   : > { %289 = vxpose.xlu1.b32.cont [2/8] (short) (narrow) %v281_v19, 8  ;;  %327 = vst.msk [vmem:[#allocation3 + $0x8] sm:$0xff] %vm224_vm0, %v326_v20 }
 0x10d   : > { %v184_v21 = vpop.trf.xlu0  ;;  %v392_v22 = vld [vmem:[#allocation2 + $0x30] ss:$2 sm:$0xff]  ;;  %v458_v26 = vld [vmem:[#allocation2 + $0x31] ss:$2 sm:$0xff] }
 0x10e   : > { %233 = vst.msk [vmem:[#allocation2 + $0x40] sm:$0xff] %vm224_vm0, %v184_v21  ;;  %v347_v23 = vld [vmem:[#allocation3 + $0x8] sm:$0xff] }
 0x10f   : > { %355 = vxpose.xlu2.b32.cont [2/8] (short) (narrow) %v347_v23, 8  ;;  %393 = vst.msk [vmem:[#allocation3 + $0x8] sm:$0xff] %vm224_vm0, %v392_v22 }
 0x115   : > { %v185_v24 = vpop.trf.xlu0 }
 0x116   : > { %234 = vst.msk [vmem:[#allocation2 + $0x48] sm:$0xff] %vm224_vm0, %v185_v24  ;;  %v935_v25 = vld [vmem:[#allocation3 + $0x8] sm:$0xff] }
 0x117   : > { %459 = vst.msk [vmem:[#allocation3 + $0x8] sm:$0xff] %vm224_vm0, %v458_v26 }
 0x11d   : > { %v186_v27 = vpop.trf.xlu0  ;;  %v263_v28 = vld [vmem:[#allocation2 + $0x40] ss:$2 sm:$0xff]  ;;  %v329_v31 = vld [vmem:[#allocation2 + $0x41] ss:$2 sm:$0xff] }
 0x11e   : > { %235 = vst.msk [vmem:[#allocation2 + $0x50] sm:$0xff] %vm224_vm0, %v186_v27  ;;  %v478_v27 = vld [vmem:[#allocation3] sm:$0xff] }
 0x11f   : > { %264 = vst.msk [vmem:[#allocation3 + $0x10] sm:$0xff] %vm224_vm0, %v263_v28 }
 0x125   : > { %v187_v29 = vpop.trf.xlu0 }
 0x126   : > { %236 = vst.msk [vmem:[#allocation2 + $0x58] sm:$0xff] %vm224_vm0, %v187_v29  ;;  %v282_v30 = vld [vmem:[#allocation3 + $0x10] sm:$0xff] }
 0x127   : > { %290 = vxpose.xlu1.b32.cont [3/8] (short) (narrow) %v282_v30, 8  ;;  %330 = vst.msk [vmem:[#allocation3 + $0x10] sm:$0xff] %vm224_vm0, %v329_v31  ;;  %v479_v30 = vld [vmem:[#allocation3 + $0x8] sm:$0xff] }
 0x12d   : > { %v188_v32 = vpop.trf.xlu0  ;;  %v395_v33 = vld [vmem:[#allocation2 + $0x50] ss:$2 sm:$0xff]  ;;  %v461_v37 = vld [vmem:[#allocation2 + $0x51] ss:$2 sm:$0xff] }
 0x12e   : > { %237 = vst.msk [vmem:[#allocation2 + $0x60] sm:$0xff] %vm224_vm0, %v188_v32  ;;  %v348_v34 = vld [vmem:[#allocation3 + $0x10] sm:$0xff] }
 0x12f   : > { %356 = vxpose.xlu2.b32.cont [3/8] (short) (narrow) %v348_v34, 8  ;;  %396 = vst.msk [vmem:[#allocation3 + $0x10] sm:$0xff] %vm224_vm0, %v395_v33 }
 0x135   : > { %v189_v35 = vpop.trf.xlu0 }
 0x136   : > { %238 = vst.msk [vmem:[#allocation2 + $0x68] sm:$0xff] %vm224_vm0, %v189_v35  ;;  %v945_v36 = vld [vmem:[#allocation3 + $0x10] sm:$0xff] }
 0x137   : > { %462 = vst.msk [vmem:[#allocation3 + $0x10] sm:$0xff] %vm224_vm0, %v461_v37 }
 0x13d   : > { %v190_v38 = vpop.trf.xlu0  ;;  %v266_v39 = vld [vmem:[#allocation2 + $0x60] ss:$2 sm:$0xff]  ;;  %v332_v42 = vld [vmem:[#allocation2 + $0x61] ss:$2 sm:$0xff] }
 0x13e   : > { %239 = vst.msk [vmem:[#allocation2 + $0x70] sm:$0xff] %vm224_vm0, %v190_v38  ;;  %v480_v31 = vld [vmem:[#allocation3 + $0x10] sm:$0xff] }
 0x13f   : > { %267 = vst.msk [vmem:[#allocation3 + $0x18] sm:$0xff] %vm224_vm0, %v266_v39 }
 0x145   : > { %v191_v40 = vpop.trf.xlu0 }
 0x146   : > { %240 = vst.msk [vmem:[#allocation2 + $0x78] sm:$0xff] %vm224_vm0, %v191_v40  ;;  %v283_v41 = vld [vmem:[#allocation3 + $0x18] sm:$0xff] }
 0x147   : > { %291 = vxpose.xlu1.b32.cont [4/8] (short) (narrow) %v283_v41, 8  ;;  %333 = vst.msk [vmem:[#allocation3 + $0x18] sm:$0xff] %vm224_vm0, %v332_v42 }
 0x14d   : > { %v208_v43 = vpop.trf.xlu0  ;;  %v398_v44 = vld [vmem:[#allocation2 + $0x70] ss:$2 sm:$0xff]  ;;  %v464_v48 = vld [vmem:[#allocation2 + $0x71] ss:$2 sm:$0xff] }
 0x14e   : > { %241 = vst.msk [vmem:[#allocation2 + $0x80] sm:$0xff] %vm224_vm0, %v208_v43  ;;  %v349_v45 = vld [vmem:[#allocation3 + $0x18] sm:$0xff] }
 0x14f   : > { %357 = vxpose.xlu2.b32.cont [4/8] (short) (narrow) %v349_v45, 8  ;;  %399 = vst.msk [vmem:[#allocation3 + $0x18] sm:$0xff] %vm224_vm0, %v398_v44 }
 0x155   : > { %v209_v46 = vpop.trf.xlu0 }
 0x156   : > { %242 = vst.msk [vmem:[#allocation2 + $0x88] sm:$0xff] %vm224_vm0, %v209_v46  ;;  %v955_v47 = vld [vmem:[#allocation3 + $0x18] sm:$0xff] }
 0x157   : > { %465 = vst.msk [vmem:[#allocation3 + $0x18] sm:$0xff] %vm224_vm0, %v464_v48 }
 0x15d   : > { %v210_v49 = vpop.trf.xlu0  ;;  %v269_v50 = vld [vmem:[#allocation2 + $0x80] ss:$2 sm:$0xff]  ;;  %v335_v53 = vld [vmem:[#allocation2 + $0x81] ss:$2 sm:$0xff] }
 0x15e   : > { %243 = vst.msk [vmem:[#allocation2 + $0x90] sm:$0xff] %vm224_vm0, %v210_v49 }
 0x15f   : > { %270 = vst.msk [vmem:[#allocation3 + $0x20] sm:$0xff] %vm224_vm0, %v269_v50 }
 0x165   : > { %v211_v51 = vpop.trf.xlu0 }
 0x166   : > { %244 = vst.msk [vmem:[#allocation2 + $0x98] sm:$0xff] %vm224_vm0, %v211_v51  ;;  %v284_v52 = vld [vmem:[#allocation3 + $0x20] sm:$0xff] }
 0x167   : > { %292 = vxpose.xlu1.b32.cont [5/8] (short) (narrow) %v284_v52, 8  ;;  %336 = vst.msk [vmem:[#allocation3 + $0x20] sm:$0xff] %vm224_vm0, %v335_v53 }
 0x16d   : > { %v212_v54 = vpop.trf.xlu0  ;;  %v401_v55 = vld [vmem:[#allocation2 + $0x90] ss:$2 sm:$0xff]  ;;  %v467_v59 = vld [vmem:[#allocation2 + $0x91] ss:$2 sm:$0xff] }
 0x16e   : > { %245 = vst.msk [vmem:[#allocation2 + $0xa0] sm:$0xff] %vm224_vm0, %v212_v54  ;;  %v350_v56 = vld [vmem:[#allocation3 + $0x20] sm:$0xff] }
 0x16f   : > { %358 = vxpose.xlu2.b32.cont [5/8] (short) (narrow) %v350_v56, 8  ;;  %402 = vst.msk [vmem:[#allocation3 + $0x20] sm:$0xff] %vm224_vm0, %v401_v55 }
 0x175   : > { %v213_v57 = vpop.trf.xlu0 }
 0x176   : > { %246 = vst.msk [vmem:[#allocation2 + $0xa8] sm:$0xff] %vm224_vm0, %v213_v57  ;;  %v965_v58 = vld [vmem:[#allocation3 + $0x20] sm:$0xff] }
 0x177   : > { %468 = vst.msk [vmem:[#allocation3 + $0x20] sm:$0xff] %vm224_vm0, %v467_v59 }
 0x17d   : > { %v214_v60 = vpop.trf.xlu0  ;;  %v272_v61 = vld [vmem:[#allocation2 + $0xa0] ss:$2 sm:$0xff]  ;;  %v338_v0 = vld [vmem:[#allocation2 + $0xa1] ss:$2 sm:$0xff] }
 0x17e   : > { %247 = vst.msk [vmem:[#allocation2 + $0xb0] sm:$0xff] %vm224_vm0, %v214_v60  ;;  %v482_v32 = vld [vmem:[#allocation3 + $0x20] sm:$0xff] }
 0x17f   : > { %273 = vst.msk [vmem:[#allocation3 + $0x28] sm:$0xff] %vm224_vm0, %v272_v61 }
 0x185   : > { %v215_v62 = vpop.trf.xlu0 }
 0x186   : > { %248 = vst.msk [vmem:[#allocation2 + $0xb8] sm:$0xff] %vm224_vm0, %v215_v62  ;;  %v285_v63 = vld [vmem:[#allocation3 + $0x28] sm:$0xff] }
 0x187   : > { %293 = vxpose.xlu1.b32.cont [6/8] (short) (narrow) %v285_v63, 8  ;;  %339 = vst.msk [vmem:[#allocation3 + $0x28] sm:$0xff] %vm224_vm0, %v338_v0 }
 0x18d   : > { %v216_v1 = vpop.trf.xlu0  ;;  %v404_v2 = vld [vmem:[#allocation2 + $0xb0] ss:$2 sm:$0xff]  ;;  %v470_v6 = vld [vmem:[#allocation2 + $0xb1] ss:$2 sm:$0xff] }
 0x18e   : > { %249 = vst.msk [vmem:[#allocation2 + $0xc0] sm:$0xff] %vm224_vm0, %v216_v1  ;;  %v351_v3 = vld [vmem:[#allocation3 + $0x28] sm:$0xff] }
 0x18f   : > { %359 = vxpose.xlu2.b32.cont [6/8] (short) (narrow) %v351_v3, 8  ;;  %405 = vst.msk [vmem:[#allocation3 + $0x28] sm:$0xff] %vm224_vm0, %v404_v2 }
 0x195   : > { %v217_v4 = vpop.trf.xlu0 }
 0x196   : > { %250 = vst.msk [vmem:[#allocation2 + $0xc8] sm:$0xff] %vm224_vm0, %v217_v4  ;;  %v417_v5 = vld [vmem:[#allocation3 + $0x28] sm:$0xff] }
 0x197   : > { %471 = vst.msk [vmem:[#allocation3 + $0x28] sm:$0xff] %vm224_vm0, %v470_v6 }
 0x19d   : > { %v218_v7 = vpop.trf.xlu0  ;;  %v275_v8 = vld [vmem:[#allocation2 + $0xc0] ss:$2 sm:$0xff]  ;;  %v341_v11 = vld [vmem:[#allocation2 + $0xc1] ss:$2 sm:$0xff] }
 0x19e   : > { %251 = vst.msk [vmem:[#allocation2 + $0xd0] sm:$0xff] %vm224_vm0, %v218_v7 }
 0x19f   : > { %276 = vst.msk [vmem:[#allocation3 + $0x30] sm:$0xff] %vm224_vm0, %v275_v8 }
 0x1a5   : > { %v219_v9 = vpop.trf.xlu0 }
 0x1a6   : > { %252 = vst.msk [vmem:[#allocation2 + $0xd8] sm:$0xff] %vm224_vm0, %v219_v9  ;;  %v286_v10 = vld [vmem:[#allocation3 + $0x30] sm:$0xff] }
 0x1a7   : > { %294 = vxpose.xlu1.b32.cont [7/8] (short) (narrow) %v286_v10, 8  ;;  %342 = vst.msk [vmem:[#allocation3 + $0x30] sm:$0xff] %vm224_vm0, %v341_v11 }
 0x1ad   : > { %v220_v12 = vpop.trf.xlu0  ;;  %v407_v13 = vld [vmem:[#allocation2 + $0xd0] ss:$2 sm:$0xff]  ;;  %v473_v18 = vld [vmem:[#allocation2 + $0xd1] ss:$2 sm:$0xff] }
 0x1ae   : > { %253 = vst.msk [vmem:[#allocation2 + $0xe0] sm:$0xff] %vm224_vm0, %v220_v12  ;;  %v352_v15 = vld [vmem:[#allocation3 + $0x30] sm:$0xff] }
 0x1af   : > { %360 = vxpose.xlu2.b32.cont [7/8] (short) (narrow) %v352_v15, 8  ;;  %408 = vst.msk [vmem:[#allocation3 + $0x30] sm:$0xff] %vm224_vm0, %v407_v13 }
 0x1b5   : > { %v221_v16 = vpop.trf.xlu0 }
 0x1b6   : > { %254 = vst.msk [vmem:[#allocation2 + $0xe8] sm:$0xff] %vm224_vm0, %v221_v16  ;;  %v418_v17 = vld [vmem:[#allocation3 + $0x30] sm:$0xff] }
 0x1b7   : > { %474 = vst.msk [vmem:[#allocation3 + $0x30] sm:$0xff] %vm224_vm0, %v473_v18 }
 0x1bd   : > { %v278_v19 = vld [vmem:[#allocation2 + $0xe0] ss:$2 sm:$0xff]  ;;  %v222_v20 = vpop.trf.xlu0  ;;  %v344_v22 = vld [vmem:[#allocation2 + $0xe1] ss:$2 sm:$0xff] }
 0x1be   : > { %279 = vst.msk [vmem:[#allocation3 + $0x38] sm:$0xff] %vm224_vm0, %v278_v19  ;;  %v484_v33 = vld [vmem:[#allocation3 + $0x30] sm:$0xff] }
 0x1bf   : > { %255 = vst.msk [vmem:[#allocation2 + $0xf0] sm:$0xff] %vm224_vm0, %v222_v20 }
 0x1c5   : > { %v287_v21 = vld [vmem:[#allocation3 + $0x38] sm:$0xff]  ;;  %v223_v23 = vpop.trf.xlu0 }
 0x1c6   : > { %295 = vxpose.xlu1.b32.end [8/8] (short) (narrow) %v287_v21, 8  ;;  %345 = vst.msk [vmem:[#allocation3 + $0x38] sm:$0xff] %vm224_vm0, %v344_v22 }
 0x1c7   : > { %256 = vst.msk [vmem:[#allocation2 + $0xf8] sm:$0xff] %vm224_vm0, %v223_v23 }
 0x1cd   : > { %v353_v24 = vld [vmem:[#allocation3 + $0x38] sm:$0xff] }
 0x1ce   : > { %420 = vxpose.xlu1.b32.start [1/8] (short) (narrow) %v925_v14, 8  ;;  %361 = vxpose.xlu2.b32.end [8/8] (short) (narrow) %v353_v24, 8  ;;  %v410_v26 = vld [vmem:[#allocation2 + $0xf0] ss:$2 sm:$0xff]  ;;  %v476_v29 = vld [vmem:[#allocation2 + $0xf1] ss:$2 sm:$0xff] }
 0x1cf   : > { %411 = vst.msk [vmem:[#allocation3 + $0x38] sm:$0xff] %vm224_vm0, %v410_v26  ;;  %v481_v14 = vld [vmem:[#allocation3 + $0x18] sm:$0xff] }
 0x1d6   : > { %421 = vxpose.xlu1.b32.cont [2/8] (short) (narrow) %v935_v25, 8  ;;  %486 = vxpose.xlu2.b32.start [1/8] (short) (narrow) %v478_v27, 8  ;;  %v419_v28 = vld [vmem:[#allocation3 + $0x38] sm:$0xff]  ;;  %v483_v25 = vld [vmem:[#allocation3 + $0x28] sm:$0xff] }
 0x1d7   : > { %477 = vst.msk [vmem:[#allocation3 + $0x38] sm:$0xff] %vm224_vm0, %v476_v29 }
 0x1de   : > { %422 = vxpose.xlu1.b32.cont [3/8] (short) (narrow) %v945_v36, 8  ;;  %487 = vxpose.xlu2.b32.cont [2/8] (short) (narrow) %v479_v30, 8  ;;  %v485_v34 = vld [vmem:[#allocation3 + $0x38] sm:$0xff] }
 0x1e6   : > { %423 = vxpose.xlu1.b32.cont [4/8] (short) (narrow) %v955_v47, 8  ;;  %488 = vxpose.xlu2.b32.cont [3/8] (short) (narrow) %v480_v31, 8 }
 0x1ee   : > { %424 = vxpose.xlu1.b32.cont [5/8] (short) (narrow) %v965_v58, 8  ;;  %489 = vxpose.xlu2.b32.cont [4/8] (short) (narrow) %v481_v14, 8 }
 0x1f6   : > { %425 = vxpose.xlu1.b32.cont [6/8] (short) (narrow) %v417_v5, 8  ;;  %490 = vxpose.xlu2.b32.cont [5/8] (short) (narrow) %v482_v32, 8 }
 0x1fe   : > { %426 = vxpose.xlu1.b32.cont [7/8] (short) (narrow) %v418_v17, 8  ;;  %491 = vxpose.xlu2.b32.cont [6/8] (short) (narrow) %v483_v25, 8 }
 0x206   : > { %492 = vxpose.xlu2.b32.cont [7/8] (short) (narrow) %v484_v33, 8  ;;  %427 = vxpose.xlu1.b32.end [8/8] (short) (narrow) %v419_v28, 8 }
 0x20e   : > { %493 = vxpose.xlu2.b32.end [8/8] (short) (narrow) %v485_v34, 8 }
 0x22f   : > { %v370_v35 = vpop.trf.xlu2 }
 0x230   : > { %633 = vst.msk [vmem:[%s152_s15 + $0x4] sm:$0xf] %vm320_vm1, %v370_v35 }
 0x232   : > { %v304_v36 = vpop.trf.xlu1 }
 0x233   : > { %321 = vst.msk [vmem:[%s152_s15] sm:$0xf] %vm320_vm1, %v304_v36 }
 0x26f   : > { %v502_v37 = vpop.trf.xlu2 }
 0x270   : > { %635 = vst.msk [vmem:[%s152_s15 + $0xc] sm:$0xf] %vm320_vm1, %v502_v37 }
 0x272   : > { %v436_v38 = vpop.trf.xlu1 }
 0x273   : > { %634 = vst.msk [vmem:[%s152_s15 + $0x8] sm:$0xf] %vm320_vm1, %v436_v38 }
 0x274   : > { %765 = shalt.err (!%p762_p13)
}
 0x275   : > { %s822_s3 = smov 64   ;;  %s823_s4 = smov 4  }
 0x276   : > { %645 = dma.vmem_to_hbm [thread:$0]  (%p885_p9), %s535_s23, 256, %s537_s24, %s521_s25, %s822_s3, %s822_s3, %s823_s4  }
 0x277 PF: > { %s551_s5 = sand.u32 1, %s800_s6   ;;  %p652_p0 = pnand %p626_p12, %p892_p11 }
 0x278   : > { %s552_s12 = scalar_lea.sflag [#allocation6], %s551_s5 }
 0x279   : > { %p653_p1 = pneg %p652_p0 }
 0x27b   : > { %795 = dma.done.wait (%p653_p1), %s552_s12, 256  }
 0x27c   : > { %797 = vsyncadd (%p653_p1), %s552_s12, 4294967040  ;;  %s17_s11 = sadd.s32 1, %s820_s11   ;;  %s1040_s6 = smov %s804_s7 }
 0x27d   : > { %p14_p2 = scmp.ge.s32.totalorder %s17_s11, 4   ;;  %s1041_s7 = smov %s808_s8 }
 0x27e   : > { %s1042_s8 = smov %s890_s20  ;;  %s1043_s9 = smov %s816_s10 }
 0x27f   : > { %s1044_s10 = smov %s1046_s14  ;;  %16 = sbr.rel (!%p14_p2) target bundleno = 6 (0x6), region = 103 }
 0x284   :  { %558 = vsyncpa [#allocation5], 1 }
 0x285   :  { %560 = vsyncpa [#allocation5 + $0x1], 1 }
 0x286   :  { %561 = vsyncpa [#allocation6], 1 }
 0x287   :  { %563 = vsyncpa [#allocation6 + $0x1], 1 }

</bundles_post_ra>
